<compile_context>
chip_gen: v6e
topology: v6e:2x2x1
jax: 0.10.0
libtpu: 0.0.40
codegen_flags: <defaults>
</compile_context>

<pallas_src>
import numpy as np
import jax
import jax.numpy as jnp
from jax.experimental import pallas as pl
from jax.experimental.pallas import tpu as pltpu


def uni3d_kernel(pc_ref, w1_ref, b1_ref, w2_ref, b2_ref, o_ref):
    # grid = (batch_chunks, point_chunks); the point axis is a running-max
    # reduction, so the output block is resident across it (accumulator).
    n = pl.program_id(1)

    @pl.when(n == 0)
    def _():
        o_ref[...] = jnp.full(o_ref.shape, -jnp.inf, o_ref.dtype)

    Bt, Tn, C = pc_ref.shape
    H2 = o_ref.shape[-1]

    # Flatten batch into the matmul M dimension: one long MXU stream instead
    # of a batched per-b matmul.  Layout-free merge of the two major dims.
    pc = pc_ref[...].reshape(Bt * Tn, C)

    # Layer 1: fused per-point embedding.  Block-diagonal W1 computes xyz@wp
    # and color@wc in a single K=C matmul (bf16 operands, f32 accumulation).
    # NOTE: this K=6 pass still costs ~a full systolic fill; move to VPU FMAs
    # only if a bundle dump shows the vmatmul slot saturating.
    z = jnp.dot(pc, w1_ref[...], preferred_element_type=jnp.float32)
    z = jnp.maximum(z + b1_ref[...], 0.0)          # bias+ReLU in f32 (v5e-safe)

    # Layer 2: fusion MLP.  W2 is the row-stacked [w2; w2] padded to H2 out
    # lanes, so (relu(pos)+relu(col)) @ w2 is one lane-dense K=2H matmul.
    h = jnp.dot(z.astype(w2_ref.dtype), w2_ref[...],
                preferred_element_type=jnp.float32)
    h = jnp.maximum(h + b2_ref[...], 0.0)

    # PointNet-style symmetric aggregation: running max over point chunks
    # (padded lanes [H:H2] stay relu(0)=0, so the wrapper's [:, :H] slice is
    # exact; every lane receives a finite value, so the -inf init vanishes).
    part = jnp.max(h.reshape(Bt, Tn, H2), axis=1)
    o_ref[...] = jnp.maximum(o_ref[...], part)


def _vmem_capacity_bytes():
    try:
        return int(pltpu.get_tpu_info().vmem_capacity_bytes)
    except Exception:
        return 64 << 20          # conservative fallback (v7x per-TC VMEM)


def _is_multi_tensorcore():
    # v7x has 2 TensorCores per chip: keep >=2 batch grid steps there so
    # dimension_semantics=("parallel", ...) can balance both cores.
    try:
        kind = jax.devices()[0].device_kind.lower()
    except Exception:
        return False
    return "v7" in kind or "7x" in kind


def _footprint_bytes(bt, tn, C, H1, H2):
    # Per-grid-step VMEM estimate: double-buffered inputs + live activations.
    pc_bytes = 2 * bt * tn * C * 2                 # bf16 pc, double buffered
    z_f32 = bt * tn * H1 * 4
    z_bf16 = bt * tn * H1 * 2
    h_f32 = bt * tn * H2 * 4
    w = 2 * (C * H1 * 2 + H1 * 4 + H1 * H2 * 2 + H2 * 4)
    out = 2 * bt * H2 * 4
    return pc_bytes + z_f32 + z_bf16 + h_f32 + w + out + (1 << 20)  # headroom


def _choose_tn(N, cap=1024):
    # Tile the point axis so VMEM use is independent of N (real Uni3D clouds
    # have N ~ 8-16k).  Tn must divide N and (unless Tn == N) be a multiple
    # of 8 to keep blocks sublane-dense and the in-kernel reshape layout-free.
    if N <= cap:
        return N
    best = None
    for d in range(8, cap + 1, 8):
        if N % d == 0:
            best = d
    return best if best is not None else N


def _choose_bt(B, Tn, C, H1, H2, budget, want_two_steps):
    # Legal batch tiles: Bt == B (full dim) or a multiple of 8 (sublane tile),
    # so the (Bt, H2) output block always satisfies the (8,128) constraint.
    cands = [d for d in range(1, B + 1)
             if B % d == 0 and (d == B or d % 8 == 0)]
    fitting = [d for d in cands
               if _footprint_bytes(d, Tn, C, H1, H2) <= budget]
    if not fitting:
        return min(cands)                # smallest legal tile
    if want_two_steps:
        split = [d for d in fitting if d < B]
        if split:
            return max(split)            # >=2 batch steps for v7x's two TCs
    return max(fitting)                  # single-TC: one big step is best


def uni3d_forward(pc, params):
    B, N, C = pc.shape
    H = params["wp"].shape[1]
    H1 = 2 * H                                   # fused embed width (128 at H=64)
    H2 = max(128, ((H + 127) // 128) * 128)      # lane-dense hidden width
    f32, bf16 = jnp.float32, jnp.bfloat16

    # Host-side weight refactoring (exact, ReLU-preserving):
    #   W1 = blockdiag(wp, wc): one K=C matmul replaces two K=3 matmuls.
    w1 = jnp.zeros((C, H1), f32).at[:3, :H].set(params["wp"]) \
                                .at[3:, H:].set(params["wc"]).astype(bf16)
    b1 = jnp.concatenate([params["bp"], params["bc"]], axis=1)        # (1, 2H)
    #   (relu(pos)+relu(col)) @ w2 == [relu(pos), relu(col)] @ [w2; w2];
    #   padded output lanes stay exactly 0 through ReLU + max-pool.
    w2 = jnp.zeros((H1, H2), f32).at[:H, :H].set(params["w2"]) \
                                 .at[H:, :H].set(params["w2"]).astype(bf16)
    b2 = jnp.zeros((1, H2), f32).at[:, :H].set(params["b2"])

    # bf16 point cloud halves HBM->VMEM DMA bytes; MXU accumulates in f32.
    pc_bf = pc.astype(bf16)

    vmem_cap = _vmem_capacity_bytes()
    vmem_limit = min(vmem_cap // 2, 64 << 20)    # 32 MiB on v7x, 64 MiB elsewhere
    budget = int(vmem_limit * 0.6)

    Tn = _choose_tn(N)
    Bt = _choose_bt(B, Tn, C, H1, H2, budget, _is_multi_tensorcore())

    cost = pl.CostEstimate(
        flops=2 * B * N * (C * H1 + H1 * H2),
        transcendentals=0,
        bytes_accessed=(2 * B * N * C + 2 * (C * H1 + H1 * H2)
                        + 4 * (H1 + H2 + B * H2)))

    def wspec(shape):
        return pl.BlockSpec(shape, lambda b, n: (0,) * len(shape))

    g = pl.pallas_call(
        uni3d_kernel,
        out_shape=jax.ShapeDtypeStruct((B, H2), jnp.float32),
        grid=(B // Bt, N // Tn),
        in_specs=[
            pl.BlockSpec((Bt, Tn, C), lambda b, n: (b, n, 0)),
            wspec(w1.shape), wspec(b1.shape),
            wspec(w2.shape), wspec(b2.shape),
        ],
        out_specs=pl.BlockSpec((Bt, H2), lambda b, n: (b, 0)),
        compiler_params=pltpu.CompilerParams(
            dimension_semantics=("parallel", "arbitrary"),
            vmem_limit_bytes=vmem_limit),
        cost_estimate=cost,
    )(pc_bf, w1, b1, w2, b2)

    # Padded lanes [H:H2] are exactly relu(0)=0, so this slice is exact.
    g = g[:, :H]

    # Final projection: one batched (B,H)@(H,E) matmul in plain XLA (an M=1,
    # 32-lane matmul per grid step inside the kernel would waste the MXU).
    return g @ params["w3"] + params["b3"]


def uni3d_reference(pc, params):
    xyz = pc[:, :, :3]
    color = pc[:, :, 3:]
    pos = jnp.maximum(xyz @ params["wp"] + params["bp"], 0.0)
    col = jnp.maximum(color @ params["wc"] + params["bc"], 0.0)
    h = jnp.maximum((pos + col) @ params["w2"] + params["b2"], 0.0)
    g = jnp.max(h, axis=1)
    return g @ params["w3"] + params["b3"]


def make_params(key, hidden=64, embed=32):
    ks = jax.random.split(key, 4)
    s = 0.02
    return {
        "wp": (s * jax.random.normal(ks[0], (3, hidden))).astype(jnp.float32),
        "bp": jnp.zeros((1, hidden), jnp.float32),
        "wc": (s * jax.random.normal(ks[1], (3, hidden))).astype(jnp.float32),
        "bc": jnp.zeros((1, hidden), jnp.float32),
        "w2": (s * jax.random.normal(ks[2], (hidden, hidden))).astype(jnp.float32),
        "b2": jnp.zeros((1, hidden), jnp.float32),
        "w3": (s * jax.random.normal(ks[3], (hidden, embed))).astype(jnp.float32),
        "b3": jnp.zeros((1, embed), jnp.float32),
    }


if __name__ == "__main__":
    B, N, C, H, E = 2, 128, 6, 64, 32

    key = jax.random.PRNGKey(0)
    k_pc, k_par = jax.random.split(key)
    pc = jax.random.normal(k_pc, (B, N, C), dtype=jnp.float32)
    params = make_params(k_par, hidden=H, embed=E)

    # nn.Parameter(torch.ones([]) * np.log(1/0.07)) — defined but unused in forward()
    logit_scale = jnp.array(np.log(1.0 / 0.07), dtype=jnp.float32)
    # TODO(synk): the real Uni3D point_encoder (FPS/kNN grouping + EVA ViT) is
    # injected from outside this module; a synthetic PointNet-style encoder is
    # used in its place.

    out = uni3d_forward(pc, params)
    jax.block_until_ready(out)

    ref = uni3d_reference(pc, params)
    np.testing.assert_allclose(np.asarray(out), np.asarray(ref),
                               rtol=1e-2, atol=1e-2)
    print("KERNEL_OK")
</pallas_src>

<mosaic_0001>
module attributes {stable_mosaic.version = 11 : i64} {
  func.func @uni3d_kernel(%arg0: i32, %arg1: i32, %arg2: memref<2x128x6xbf16, #tpu.memory_space<vmem>>, %arg3: memref<6x128xbf16, #tpu.memory_space<vmem>>, %arg4: memref<1x128xf32, #tpu.memory_space<vmem>>, %arg5: memref<128x128xbf16, #tpu.memory_space<vmem>>, %arg6: memref<1x128xf32, #tpu.memory_space<vmem>>, %arg7: memref<2x128xf32, #tpu.memory_space<vmem>>) attributes {dimension_semantics = [#tpu.dimension_semantics<parallel>, #tpu.dimension_semantics<arbitrary>], iteration_bounds = array<i64: 1, 1>, scalar_prefetch = 0 : i64, scratch_operands = 0 : i64, tpu.core_type = #tpu.core_type<tc>, window_params = [{transform_indices = @transform_0, window_bounds = array<i64: 2, 128, 6>}, {pipeline_mode = #tpu.pipeline_mode<synchronous>, transform_indices = @transform_1, window_bounds = array<i64: 6, 128>}, {pipeline_mode = #tpu.pipeline_mode<synchronous>, transform_indices = @transform_2, window_bounds = array<i64: 1, 128>}, {pipeline_mode = #tpu.pipeline_mode<synchronous>, transform_indices = @transform_3, window_bounds = array<i64: 128, 128>}, {pipeline_mode = #tpu.pipeline_mode<synchronous>, transform_indices = @transform_4, window_bounds = array<i64: 1, 128>}, {transform_indices = @transform_5, window_bounds = array<i64: 2, 128>}]} {
    %c0_i32 = arith.constant 0 : i32
    %0 = arith.cmpi eq, %arg1, %c0_i32 : i32
    %1 = arith.extui %0 : i1 to i32
    %c0_i32_0 = arith.constant 0 : i32
    %2 = arith.cmpi ne, %1, %c0_i32_0 : i32
    scf.if %2 {
      %cst_19 = arith.constant 0xFF800000 : f32
      %25 = vector.broadcast %cst_19 : f32 to vector<2x128xf32>
      %c0_20 = arith.constant 0 : index
      %c0_21 = arith.constant 0 : index
      %26 = vector.load %arg7[%c0_20, %c0_21] : memref<2x128xf32, #tpu.memory_space<vmem>>, vector<2x128xf32>
      tpu.vector_store %arg7[%c0_20, %c0_21], %25 {strides = array<i32>} : memref<2x128xf32, #tpu.memory_space<vmem>>, vector<2x128xf32>,
    } else {
    }
    %c0 = arith.constant 0 : index
    %c0_1 = arith.constant 0 : index
    %c0_2 = arith.constant 0 : index
    %3 = vector.load %arg2[%c0, %c0_1, %c0_2] : memref<2x128x6xbf16, #tpu.memory_space<vmem>>, vector<2x128x6xbf16>
    %4 = vector.shape_cast %3 : vector<2x128x6xbf16> to vector<256x6xbf16>
    %c0_3 = arith.constant 0 : index
    %c0_4 = arith.constant 0 : index
    %5 = vector.load %arg3[%c0_3, %c0_4] : memref<6x128xbf16, #tpu.memory_space<vmem>>, vector<6x128xbf16>
    %cst = arith.constant dense<0.000000e+00> : vector<256x128xf32>
    %6 = tpu.matmul %4, %5, %cst {dimension_numbers = #tpu.dot_dimension_numbers<[1], [0], [0], [1], [0, 0, 1, 1], [], []>} : vector<256x6xbf16>, vector<6x128xbf16>, vector<256x128xf32> -> vector<256x128xf32>
    %c0_5 = arith.constant 0 : index
    %c0_6 = arith.constant 0 : index
    %7 = vector.load %arg4[%c0_5, %c0_6] : memref<1x128xf32, #tpu.memory_space<vmem>>, vector<1x128xf32>
    %8 = vector.broadcast %7 : vector<1x128xf32> to vector<256x128xf32>
    %9 = arith.addf %6, %8 : vector<256x128xf32>
    %cst_7 = arith.constant 0.000000e+00 : f32
    %10 = vector.broadcast %cst_7 : f32 to vector<256x128xf32>
    %11 = arith.maximumf %9, %10 : vector<256x128xf32>
    %12 = arith.truncf %11 : vector<256x128xf32> to vector<256x128xbf16>
    %c0_8 = arith.constant 0 : index
    %c0_9 = arith.constant 0 : index
    %13 = vector.load %arg5[%c0_8, %c0_9] : memref<128x128xbf16, #tpu.memory_space<vmem>>, vector<128x128xbf16>
    %cst_10 = arith.constant dense<0.000000e+00> : vector<256x128xf32>
    %14 = tpu.matmul %12, %13, %cst_10 {dimension_numbers = #tpu.dot_dimension_numbers<[1], [0], [0], [1], [0, 0, 1, 1], [], []>} : vector<256x128xbf16>, vector<128x128xbf16>, vector<256x128xf32> -> vector<256x128xf32>
    %c0_11 = arith.constant 0 : index
    %c0_12 = arith.constant 0 : index
    %15 = vector.load %arg6[%c0_11, %c0_12] : memref<1x128xf32, #tpu.memory_space<vmem>>, vector<1x128xf32>
    %16 = vector.broadcast %15 : vector<1x128xf32> to vector<256x128xf32>
    %17 = arith.addf %14, %16 : vector<256x128xf32>
    %cst_13 = arith.constant 0.000000e+00 : f32
    %18 = vector.broadcast %cst_13 : f32 to vector<256x128xf32>
    %19 = arith.maximumf %17, %18 : vector<256x128xf32>
    %20 = vector.shape_cast %19 : vector<256x128xf32> to vector<2x128x128xf32>
    %cst_14 = arith.constant dense<0xFF800000> : vector<2x128xf32>
    %21 = vector.multi_reduction <maximumf>, %20, %cst_14 [1] : vector<2x128x128xf32> to vector<2x128xf32>
    %c0_15 = arith.constant 0 : index
    %c0_16 = arith.constant 0 : index
    %22 = vector.load %arg7[%c0_15, %c0_16] : memref<2x128xf32, #tpu.memory_space<vmem>>, vector<2x128xf32>
    %23 = arith.maximumf %22, %21 : vector<2x128xf32>
    %c0_17 = arith.constant 0 : index
    %c0_18 = arith.constant 0 : index
    %24 = vector.load %arg7[%c0_17, %c0_18] : memref<2x128xf32, #tpu.memory_space<vmem>>, vector<2x128xf32>
    tpu.vector_store %arg7[%c0_17, %c0_18], %23 {strides = array<i32>} : memref<2x128xf32, #tpu.memory_space<vmem>>, vector<2x128xf32>,
    return
  }
  func.func @transform_0(%arg0: i32, %arg1: i32) -> (i32, i32, i32) {
    %c0_i32 = arith.constant 0 : i32
    %c0_i32_0 = arith.constant 0 : i32
    return %arg0, %arg1, %c0_i32 : i32, i32, i32
  }
  func.func @transform_1(%arg0: i32, %arg1: i32) -> (i32, i32) {
    %c0_i32 = arith.constant 0 : i32
    %c0_i32_0 = arith.constant 0 : i32
    %c0_i32_1 = arith.constant 0 : i32
    return %c0_i32, %c0_i32_0 : i32, i32
  }
  func.func @transform_2(%arg0: i32, %arg1: i32) -> (i32, i32) {
    %c0_i32 = arith.constant 0 : i32
    %c0_i32_0 = arith.constant 0 : i32
    %c0_i32_1 = arith.constant 0 : i32
    return %c0_i32, %c0_i32_0 : i32, i32
  }
  func.func @transform_3(%arg0: i32, %arg1: i32) -> (i32, i32) {
    %c0_i32 = arith.constant 0 : i32
    %c0_i32_0 = arith.constant 0 : i32
    %c0_i32_1 = arith.constant 0 : i32
    return %c0_i32, %c0_i32_0 : i32, i32
  }
  func.func @transform_4(%arg0: i32, %arg1: i32) -> (i32, i32) {
    %c0_i32 = arith.constant 0 : i32
    %c0_i32_0 = arith.constant 0 : i32
    %c0_i32_1 = arith.constant 0 : i32
    return %c0_i32, %c0_i32_0 : i32, i32
  }
  func.func @transform_5(%arg0: i32, %arg1: i32) -> (i32, i32) {
    %c0_i32 = arith.constant 0 : i32
    %c0_i32_0 = arith.constant 0 : i32
    return %arg0, %c0_i32 : i32, i32
  }
}

</mosaic_0001>

<bundles_post_ra>
// kernel: tpu_custom_call.1
= control target key start
LH: loop header
LB: loop body
LE: loop exit
PB: predicated region body
PF: predicated region fallthrough
CT: control target
= control target key end

     0   :  { %vm196_vm0 = vcmask 1042432   ;;  %vm147_vm1 = vcmask 48128   ;;  %s1170_s0 = inlined_call_operand.vmem [shape: bf16[2,128,6], index: 0, kind: input, shape index: {}]   ;;  %s1171_s1 = inlined_call_operand.vmem [shape: bf16[6,128], index: 1, kind: input, shape index: {}]   ;;  %s1172_s2 = inlined_call_operand.vmem [shape: f32[1,128], index: 2, kind: input, shape index: {}]   ;;  %s1173_s3 = inlined_call_operand.vmem [shape: bf16[128,128], index: 3, kind: input, shape index: {}]   ;;  %s1174_s4 = inlined_call_operand.vmem [shape: f32[1,128], index: 4, kind: input, shape index: {}]   ;;  %s1175_s5 = inlined_call_operand.hbm [shape: f32[2,128], index: 5, kind: output, shape index: {}]  }
   0x1   :  { %v59_v0 = vld [vmem:[%s1171_s1] sm:$0x7]  ;;  %v922_v3 = vld [vmem:[%s1170_s0 + $0x8] sm:$0xff]   ;;  %v923_v4 = vld [vmem:[%s1170_s0 + $0x10] sm:$0xff]  }
   0x2   :  { %v921_v1 = vld [vmem:[%s1170_s0] sm:$0xff]   ;;  %918 = vmatprep.subr.msk.bf16.mxu0 %vm196_vm0, %v59_v0  ;;  %v198_v2 = vsel %vm196_vm0, %v59_v0, 0  ;;  %v924_v5 = vld [vmem:[%s1170_s0 + $0x18] sm:$0xff]   ;;  %v926_v7 = vld [vmem:[%s1170_s0 + $0x28] sm:$0xff]  }
   0x3   :  { %821 = vmatpush3.bf16.msra.mxu0 %v198_v2  ;;  %822 = vmatprep.mubr.msk.bf16.mxu0 %vm147_vm1, %v921_v1  ;;  %v925_v6 = vld [vmem:[%s1170_s0 + $0x20] sm:$0xff]   ;;  %v927_v8 = vld [vmem:[%s1170_s0 + $0x30] sm:$0xff]   ;;  %v937_v9 = vld [vmem:[%s1173_s3 + $0x38] sm:$0xff]  }
   0x4   :  { %v938_v10 = vld [vmem:[%s1173_s3 + $0x30] sm:$0xff]   ;;  %854 = vmatprep.subr.bf16.mxu0 %v937_v9  ;;  %902 = vmatprep.subr.bf16.mxu1 %v937_v9  ;;  %v939_v11 = vld [vmem:[%s1173_s3 + $0x28] sm:$0xff]  }
   0x5   :  { %910 = vmatpush3.bf16.msra.mxu1 %v937_v9 }
   0x6   :  { %823 = vmatmul.mubr.msk.bf16.vlgmr.msra.gmra.mxu0 %vm147_vm1, %v922_v3  ;;  %903 = vmatprep.subr.bf16.mxu1 %v938_v10 }
   0x7   :  { %826 = vmatprep.mubr.msk.bf16.mxu0 %vm147_vm1, %v923_v4  ;;  %855 = vmatpush3.bf16.msra.mxu0 %v937_v9 }
   0x8   :  { %856 = vmatprep.subr.bf16.mxu0 %v938_v10 }
   0xe   :  { %827 = vmatmul.mubr.msk.bf16.gmra.mxu0 %vm147_vm1, %v924_v5 }
   0xf   :  { %830 = vmatprep.mubr.msk.bf16.mxu0 %vm147_vm1, %v925_v6 }
  0x16   :  { %831 = vmatmul.mubr.msk.bf16.gmra.mxu0 %vm147_vm1, %v926_v7 }
  0x17   :  { %834 = vmatprep.mubr.msk.bf16.mxu0 %vm147_vm1, %v927_v8 }
  0x18   :  { %10 = vsyncpa [#allocation3], 0  ;;  %857 = vmatpush3.bf16.msra.mxu0 %v938_v10  ;;  %911 = vmatpush3.bf16.msra.mxu1 %v938_v10  ;;  %v928_v12 = vld [vmem:[%s1170_s0 + $0x38] sm:$0xff]   ;;  %v940_v13 = vld [vmem:[%s1173_s3 + $0x20] sm:$0xff]   ;;  %vm718_vm2 = vcmask 1041409  }
  0x19   :  { %858 = vmatprep.subr.bf16.mxu0 %v939_v11  ;;  %904 = vmatprep.subr.bf16.mxu1 %v939_v11  ;;  %v929_v14 = vld [vmem:[%s1170_s0 + $0x40] sm:$0xff]   ;;  %v941_v15 = vld [vmem:[%s1173_s3 + $0x18] sm:$0xff]   ;;  %v930_v16 = vld [vmem:[%s1170_s0 + $0x48] sm:$0xff]  }
  0x1a   :  { %v931_v17 = vld [vmem:[%s1170_s0 + $0x50] sm:$0xff]   ;;  %v932_v18 = vld [vmem:[%s1170_s0 + $0x58] sm:$0xff]   ;;  %v933_v19 = vld [vmem:[%s1170_s0 + $0x60] sm:$0xff]  }
  0x1b   :  { %v934_v20 = vld [vmem:[%s1170_s0 + $0x68] sm:$0xff]   ;;  %v935_v21 = vld [vmem:[%s1170_s0 + $0x70] sm:$0xff]   ;;  %v936_v22 = vld [vmem:[%s1170_s0 + $0x78] sm:$0xff]  }
  0x1c   :  { %859 = vmatpush3.bf16.msra.mxu0 %v939_v11  ;;  %912 = vmatpush3.bf16.msra.mxu1 %v939_v11  ;;  %v942_v23 = vld [vmem:[%s1173_s3 + $0x10] sm:$0xff]   ;;  %v943_v24 = vld [vmem:[%s1173_s3 + $0x8] sm:$0xff]   ;;  %v944_v25 = vld [vmem:[%s1173_s3] sm:$0xff]  }
  0x1d   :  { %860 = vmatprep.subr.bf16.mxu0 %v940_v13  ;;  %905 = vmatprep.subr.bf16.mxu1 %v940_v13  ;;  %v1093_v28 = vld [vmem:[%s1172_s2] ss:$0 sm:$0xff] }
  0x1e   :  { %835 = vmatmul.mubr.msk.bf16.gmra.mxu0 %vm147_vm1, %v928_v12 }
  0x1f   :  { %838 = vmatprep.mubr.msk.bf16.mxu0 %vm147_vm1, %v929_v14 }
  0x20   :  { %861 = vmatpush3.bf16.msra.mxu0 %v940_v13  ;;  %913 = vmatpush3.bf16.msra.mxu1 %v940_v13 }
  0x21   :  { %862 = vmatprep.subr.bf16.mxu0 %v941_v15  ;;  %906 = vmatprep.subr.bf16.mxu1 %v941_v15 }
  0x24   :  { %863 = vmatpush3.bf16.msra.mxu0 %v941_v15  ;;  %914 = vmatpush3.bf16.msra.mxu1 %v941_v15 }
  0x25   :  { %864 = vmatprep.subr.bf16.mxu0 %v942_v23  ;;  %907 = vmatprep.subr.bf16.mxu1 %v942_v23 }
  0x26   :  { %839 = vmatmul.mubr.msk.bf16.gmra.mxu0 %vm147_vm1, %v930_v16 }
  0x27   :  { %842 = vmatprep.mubr.msk.bf16.mxu0 %vm147_vm1, %v931_v17 }
  0x28   :  { %865 = vmatpush3.bf16.msra.mxu0 %v942_v23  ;;  %915 = vmatpush3.bf16.msra.mxu1 %v942_v23 }
  0x29   :  { %866 = vmatprep.subr.bf16.mxu0 %v943_v24  ;;  %908 = vmatprep.subr.bf16.mxu1 %v943_v24 }
  0x2c   :  { %867 = vmatpush3.bf16.msra.mxu0 %v943_v24  ;;  %916 = vmatpush3.bf16.msra.mxu1 %v943_v24 }
  0x2d   :  { %868 = vmatprep.subr.bf16.mxu0 %v944_v25  ;;  %909 = vmatprep.subr.bf16.mxu1 %v944_v25 }
  0x2e   :  { %843 = vmatmul.mubr.msk.bf16.gmra.mxu0 %vm147_vm1, %v932_v18 }
  0x2f   :  { %846 = vmatprep.mubr.msk.bf16.mxu0 %vm147_vm1, %v933_v19 }
  0x30   :  { %869 = vmatpush3.bf16.msra.mxu0 %v944_v25  ;;  %917 = vmatpush3.bf16.msra.mxu1 %v944_v25 }
  0x36   :  { %847 = vmatmul.mubr.msk.bf16.gmra.mxu0 %vm147_vm1, %v934_v20 }
  0x37   :  { %850 = vmatprep.mubr.msk.bf16.mxu0 %vm147_vm1, %v935_v21 }
  0x3e   :  { %851 = vmatmul.mubr.msk.bf16.gmra.mxu0 %vm147_vm1, %v936_v22 }
  0xc6   :  { %v824_v26 = vpop.f32.mrf.mxu0 }
  0xc7   :  { %v243_v32 = vadd.f32 %v824_v26, %v1093_v28 }
  0xc8   :  { %v234_v27 = vpop.f32.mrf.mxu0 }
  0xc9   :  { %v235_v30 = vadd.f32 %v1093_v28, %v234_v27  ;;  %v363_v39 = vmax.f32 %v243_v32, 0.0 }
  0xca   :  { %v825_v29 = vpop.f32.mrf.mxu0 }
  0xcb   :  { %v246_v31 = vadd.f32 %v825_v29, %v1093_v28  ;;  %v361_v37 = vmax.f32 %v235_v30, 0.0 }
  0xcc   :  { %v237_v33 = vpop.f32.mrf.mxu0 }
  0xcd   :  { %v238_v34 = vadd.f32 %v1093_v28, %v237_v33  ;;  %v364_v35 = vmax.f32 %v246_v31, 0.0 }
  0xce   :  { %v828_v36 = vpop.f32.mrf.mxu0 }
  0xcf   :  { %v362_v38 = vmax.f32 %v238_v34, 0.0  ;;  %v394_v42 = vpack.c.bf16 %v364_v35, %v363_v39  ;;  %v259_v46 = vadd.f32 %v828_v36, %v1093_v28 }
  0xd0   :  { %v250_v40 = vpop.f32.mrf.mxu0 }
  0xd1   :  { %v393_v41 = vpack.c.bf16 %v362_v38, %v361_v37  ;;  %v251_v44 = vadd.f32 %v1093_v28, %v250_v40  ;;  %v367_v53 = vmax.f32 %v259_v46, 0.0 }
  0xd2   :  { %v829_v43 = vpop.f32.mrf.mxu0 }
  0xd3   :  { %v262_v45 = vadd.f32 %v829_v43, %v1093_v28  ;;  %870 = vmatprep.mubr.bf16.mxu0 %v393_v41  ;;  %v365_v51 = vmax.f32 %v251_v44, 0.0 }
  0xd4   :  { %v253_v47 = vpop.f32.mrf.mxu0  ;;  %871 = vmatmul.mubr.bf16.vlgmr.msra.gmra.mxu0 %v394_v42 }
  0xd5   :  { %v254_v48 = vadd.f32 %v1093_v28, %v253_v47  ;;  %v368_v49 = vmax.f32 %v262_v45, 0.0 }
  0xd6   :  { %v832_v50 = vpop.f32.mrf.mxu0 }
  0xd7   :  { %v366_v52 = vmax.f32 %v254_v48, 0.0  ;;  %v396_v56 = vpack.c.bf16 %v368_v49, %v367_v53  ;;  %v275_v60 = vadd.f32 %v832_v50, %v1093_v28 }
  0xd8   :  { %v266_v54 = vpop.f32.mrf.mxu0 }
  0xd9   :  { %v395_v55 = vpack.c.bf16 %v366_v52, %v365_v51  ;;  %v267_v58 = vadd.f32 %v1093_v28, %v266_v54  ;;  %v371_v3 = vmax.f32 %v275_v60, 0.0 }
  0xda   :  { %v833_v57 = vpop.f32.mrf.mxu0 }
  0xdb   :  { %v278_v59 = vadd.f32 %v833_v57, %v1093_v28  ;;  %874 = vmatprep.mubr.bf16.mxu1 %v395_v55  ;;  %v369_v1 = vmax.f32 %v267_v58, 0.0 }
  0xdc   :  { %v269_v61 = vpop.f32.mrf.mxu0  ;;  %875 = vmatmul.mubr.bf16.vlgmr.msra.gmra.mxu1 %v396_v56 }
  0xdd   :  { %v270_v62 = vadd.f32 %v1093_v28, %v269_v61  ;;  %v372_v63 = vmax.f32 %v278_v59, 0.0 }
  0xde   :  { %v836_v0 = vpop.f32.mrf.mxu0 }
  0xdf   :  { %v370_v2 = vmax.f32 %v270_v62, 0.0  ;;  %v398_v6 = vpack.c.bf16 %v372_v63, %v371_v3  ;;  %v291_v10 = vadd.f32 %v836_v0, %v1093_v28 }
  0xe0   :  { %v282_v4 = vpop.f32.mrf.mxu0 }
  0xe1   :  { %v397_v5 = vpack.c.bf16 %v370_v2, %v369_v1  ;;  %v283_v8 = vadd.f32 %v1093_v28, %v282_v4  ;;  %v375_v17 = vmax.f32 %v291_v10, 0.0 }
  0xe2   :  { %v837_v7 = vpop.f32.mrf.mxu0 }
  0xe3   :  { %v294_v9 = vadd.f32 %v837_v7, %v1093_v28  ;;  %878 = vmatprep.mubr.bf16.mxu1 %v397_v5  ;;  %v373_v15 = vmax.f32 %v283_v8, 0.0 }
  0xe4   :  { %v285_v11 = vpop.f32.mrf.mxu0  ;;  %879 = vmatmul.mubr.bf16.gmra.mxu1 %v398_v6 }
  0xe5   :  { %v286_v12 = vadd.f32 %v1093_v28, %v285_v11  ;;  %v376_v13 = vmax.f32 %v294_v9, 0.0 }
  0xe6   :  { %v840_v14 = vpop.f32.mrf.mxu0 }
  0xe7   :  { %v374_v16 = vmax.f32 %v286_v12, 0.0  ;;  %v400_v20 = vpack.c.bf16 %v376_v13, %v375_v17  ;;  %v307_v24 = vadd.f32 %v840_v14, %v1093_v28  ;;  %v967_v12 = vmov -inf  }
  0xe8   :  { %v298_v18 = vpop.f32.mrf.mxu0  ;;  %26 = vst [vmem:[#allocation2] sm:$0x3] %v967_v12 }
  0xe9   :  { %v399_v19 = vpack.c.bf16 %v374_v16, %v373_v15  ;;  %v299_v22 = vadd.f32 %v1093_v28, %v298_v18  ;;  %v379_v32 = vmax.f32 %v307_v24, 0.0 }
  0xea   :  { %v841_v21 = vpop.f32.mrf.mxu0 }
  0xeb   :  { %v310_v23 = vadd.f32 %v841_v21, %v1093_v28  ;;  %882 = vmatprep.mubr.bf16.mxu1 %v399_v19  ;;  %v377_v30 = vmax.f32 %v299_v22, 0.0 }
  0xec   :  { %v301_v25 = vpop.f32.mrf.mxu0  ;;  %883 = vmatmul.mubr.bf16.gmra.mxu1 %v400_v20 }
  0xed   :  { %v302_v26 = vadd.f32 %v1093_v28, %v301_v25  ;;  %v380_v27 = vmax.f32 %v310_v23, 0.0 }
  0xee   :  { %v844_v29 = vpop.f32.mrf.mxu0 }
  0xef   :  { %v378_v31 = vmax.f32 %v302_v26, 0.0  ;;  %v402_v35 = vpack.c.bf16 %v380_v27, %v379_v32  ;;  %v323_v39 = vadd.f32 %v844_v29, %v1093_v28  ;;  %v1132_v26 = vld [vmem:[%s1174_s4] ss:$0 sm:$0xff]  ;;  %s968_s4 = smov [#allocation2]  }
  0xf0   :  { %v314_v33 = vpop.f32.mrf.mxu0  ;;  %s729_s17 = sshll.u32 %s968_s4, 4  ;;  %s730_s17 = int_to_ptr.vmem [resolvable:$true] %s729_s17 }
  0xf1   :  { %v401_v34 = vpack.c.bf16 %v378_v31, %v377_v30  ;;  %v315_v37 = vadd.f32 %v1093_v28, %v314_v33  ;;  %v383_v46 = vmax.f32 %v323_v39, 0.0  ;;  %s945_s18 = scalar_lea.vmem %s730_s17, 32  ;;  %p950_p1 = scmp.lt.s32.totalorder %s730_s17, %s730_s17 }
  0xf2   :  { %v845_v36 = vpop.f32.mrf.mxu0  ;;  %p946_p0 = scmp.ne.s32.totalorder %s730_s17, %s945_s18  ;;  %p951_p2 = scmp.lt.s32.totalorder %s945_s18, %s945_s18 }
  0xf3   :  { %v326_v38 = vadd.f32 %v845_v36, %v1093_v28  ;;  %886 = vmatprep.mubr.bf16.mxu1 %v401_v34  ;;  %v381_v44 = vmax.f32 %v315_v37, 0.0 }
  0xf4   :  { %v317_v40 = vpop.f32.mrf.mxu0  ;;  %887 = vmatmul.mubr.bf16.gmra.mxu1 %v402_v35  ;;  %p952_p3 = por %p951_p2, %p950_p1 }
  0xf5   :  { %v318_v41 = vadd.f32 %v1093_v28, %v317_v40  ;;  %v384_v42 = vmax.f32 %v326_v38, 0.0 }
  0xf6   :  { %v848_v43 = vpop.f32.mrf.mxu0  ;;  %p953_p4 = pnand %p952_p3, %p946_p0 }
  0xf7   :  { %v382_v45 = vmax.f32 %v318_v41, 0.0  ;;  %v404_v49 = vpack.c.bf16 %v384_v42, %v383_v46  ;;  %v339_v53 = vadd.f32 %v848_v43, %v1093_v28 }
  0xf8   :  { %v330_v47 = vpop.f32.mrf.mxu0 }
  0xf9   :  { %v403_v48 = vpack.c.bf16 %v382_v45, %v381_v44  ;;  %v331_v51 = vadd.f32 %v1093_v28, %v330_v47  ;;  %v387_v60 = vmax.f32 %v339_v53, 0.0 }
  0xfa   :  { %v849_v50 = vpop.f32.mrf.mxu0 }
  0xfb   :  { %v342_v52 = vadd.f32 %v849_v50, %v1093_v28  ;;  %890 = vmatprep.mubr.bf16.mxu1 %v403_v48  ;;  %v385_v58 = vmax.f32 %v331_v51, 0.0 }
  0xfc   :  { %v333_v54 = vpop.f32.mrf.mxu0  ;;  %891 = vmatmul.mubr.bf16.gmra.mxu1 %v404_v49 }
  0xfd   :  { %v334_v55 = vadd.f32 %v1093_v28, %v333_v54  ;;  %v388_v56 = vmax.f32 %v342_v52, 0.0 }
  0xfe   :  { %v852_v57 = vpop.f32.mrf.mxu0 }
  0xff   :  { %v386_v59 = vmax.f32 %v334_v55, 0.0  ;;  %v406_v63 = vpack.c.bf16 %v388_v56, %v387_v60  ;;  %v355_v3 = vadd.f32 %v852_v57, %v1093_v28 }
 0x100   :  { %v346_v61 = vpop.f32.mrf.mxu0 }
 0x101   :  { %v405_v62 = vpack.c.bf16 %v386_v59, %v385_v58  ;;  %v347_v1 = vadd.f32 %v1093_v28, %v346_v61  ;;  %v391_v9 = vmax.f32 %v355_v3, 0.0 }
 0x102   :  { %v853_v0 = vpop.f32.mrf.mxu0 }
 0x103   :  { %v358_v2 = vadd.f32 %v853_v0, %v1093_v28  ;;  %894 = vmatprep.mubr.bf16.mxu1 %v405_v62  ;;  %v389_v7 = vmax.f32 %v347_v1, 0.0 }
 0x104   :  { %v349_v4 = vpop.f32.mrf.mxu0  ;;  %895 = vmatmul.mubr.bf16.gmra.mxu1 %v406_v63 }
 0x105   :  { %v350_v5 = vadd.f32 %v1093_v28, %v349_v4  ;;  %v392_v6 = vmax.f32 %v358_v2, 0.0 }
 0x107   :  { %v390_v8 = vmax.f32 %v350_v5, 0.0  ;;  %v408_v11 = vpack.c.bf16 %v392_v6, %v391_v9 }
 0x109   :  { %v407_v10 = vpack.c.bf16 %v390_v8, %v389_v7 }
 0x10b   :  { %898 = vmatprep.mubr.bf16.mxu1 %v407_v10 }
 0x10c   :  { %899 = vmatmul.mubr.bf16.gmra.mxu1 %v408_v11 }
 0x194   :  { %v872_v16 = vpop.f32.mrf.mxu0 }
 0x195   :  { %v523_v34 = vadd.f32 %v872_v16, %v1132_v26 }
 0x196   :  { %v514_v19 = vpop.f32.mrf.mxu0 }
 0x197   :  { %v515_v30 = vadd.f32 %v1132_v26, %v514_v19  ;;  %v643_v42 = vmax.f32 %v523_v34, 0.0 }
 0x198   :  { %v873_v28 = vpop.f32.mrf.mxu0 }
 0x199   :  { %v526_v31 = vadd.f32 %v873_v28, %v1132_v26  ;;  %v641_v38 = vmax.f32 %v515_v30, 0.0 }
 0x19a   :  { %v517_v24 = vpop.f32.mrf.mxu0 }
 0x19b   :  { %v518_v27 = vadd.f32 %v1132_v26, %v517_v24  ;;  %v644_v39 = vmax.f32 %v526_v31, 0.0  ;;  %v673_v50 = vmax.f32 %v641_v38, %v643_v42 }
 0x19c   :  { %v876_v13 = vpop.f32.mrf.mxu1 }
 0x19d   :  { %v642_v35 = vmax.f32 %v518_v27, 0.0  ;;  %v539_v48 = vadd.f32 %v876_v13, %v1132_v26 }
 0x19e   :  { %v530_v14 = vpop.f32.mrf.mxu1 }
 0x19f   :  { %v531_v36 = vadd.f32 %v1132_v26, %v530_v14  ;;  %v674_v43 = vmax.f32 %v642_v35, %v644_v39  ;;  %v647_v57 = vmax.f32 %v539_v48, 0.0 }
 0x1a0   :  { %v877_v15 = vpop.f32.mrf.mxu1 }
 0x1a1   :  { %v645_v44 = vmax.f32 %v531_v36, 0.0  ;;  %v542_v45 = vadd.f32 %v877_v15, %v1132_v26 }
 0x1a2   :  { %v533_v17 = vpop.f32.mrf.mxu1 }
 0x1a3   :  { %v534_v32 = vadd.f32 %v1132_v26, %v533_v17  ;;  %v675_v53 = vmax.f32 %v673_v50, %v645_v44  ;;  %v648_v54 = vmax.f32 %v542_v45, 0.0 }
 0x1a4   :  { %v880_v18 = vpop.f32.mrf.mxu1 }
 0x1a5   :  { %v646_v40 = vmax.f32 %v534_v32, 0.0  ;;  %v555_v0 = vadd.f32 %v880_v18, %v1132_v26  ;;  %v677_v1 = vmax.f32 %v675_v53, %v647_v57 }
 0x1a6   :  { %v546_v20 = vpop.f32.mrf.mxu1 }
 0x1a7   :  { %v547_v49 = vadd.f32 %v1132_v26, %v546_v20  ;;  %v676_v51 = vmax.f32 %v674_v43, %v646_v40  ;;  %v651_v13 = vmax.f32 %v555_v0, 0.0 }
 0x1a8   :  { %v881_v21 = vpop.f32.mrf.mxu1 }
 0x1a9   :  { %v649_v58 = vmax.f32 %v547_v49, 0.0  ;;  %v558_v59 = vadd.f32 %v881_v21, %v1132_v26  ;;  %v678_v60 = vmax.f32 %v676_v51, %v648_v54 }
 0x1aa   :  { %v549_v22 = vpop.f32.mrf.mxu1 }
 0x1ab   :  { %v550_v46 = vadd.f32 %v1132_v26, %v549_v22  ;;  %v679_v8 = vmax.f32 %v677_v1, %v649_v58  ;;  %v652_v9 = vmax.f32 %v558_v59, 0.0 }
 0x1ac   :  { %v1127_v23 = vpop.f32.mrf.mxu1 }
 0x1ad   :  { %v650_v55 = vmax.f32 %v550_v46, 0.0  ;;  %v571_v22 = vadd.f32 %v1127_v23, %v1132_v26  ;;  %v681_v24 = vmax.f32 %v679_v8, %v651_v13 }
 0x1ae   :  { %v562_v25 = vpop.f32.mrf.mxu1 }
 0x1af   :  { %v680_v2 = vmax.f32 %v678_v60, %v650_v55  ;;  %v563_v3 = vadd.f32 %v1132_v26, %v562_v25  ;;  %v655_v40 = vmax.f32 %v571_v22, 0.0 }
 0x1b0   :  { %v885_v29 = vpop.f32.mrf.mxu1 }
 0x1b1   :  { %v653_v16 = vmax.f32 %v563_v3, 0.0  ;;  %v574_v17 = vadd.f32 %v885_v29, %v1132_v26  ;;  %v682_v18 = vmax.f32 %v680_v2, %v652_v9 }
 0x1b2   :  { %v565_v33 = vpop.f32.mrf.mxu1 }
 0x1b3   :  { %v566_v61 = vadd.f32 %v1132_v26, %v565_v33  ;;  %v683_v35 = vmax.f32 %v681_v24, %v653_v16  ;;  %v656_v29 = vmax.f32 %v574_v17, 0.0  ;;  %v715_v24 = vld [vmem:[#allocation2] sm:$0x3] }
 0x1b4   :  { %v888_v37 = vpop.f32.mrf.mxu1 }
 0x1b5   :  { %v587_v4 = vadd.f32 %v888_v37, %v1132_v26  ;;  %v654_v10 = vmax.f32 %v566_v61, 0.0  ;;  %v685_v46 = vmax.f32 %v683_v35, %v655_v40 }
 0x1b6   :  { %v578_v41 = vpop.f32.mrf.mxu1 }
 0x1b7   :  { %v579_v62 = vadd.f32 %v1132_v26, %v578_v41  ;;  %v659_v19 = vmax.f32 %v587_v4, 0.0  ;;  %v684_v25 = vmax.f32 %v682_v18, %v654_v10 }
 0x1b8   :  { %v889_v47 = vpop.f32.mrf.mxu1 }
 0x1b9   :  { %v657_v11 = vmax.f32 %v579_v62, 0.0  ;;  %v590_v14 = vadd.f32 %v889_v47, %v1132_v26  ;;  %v686_v41 = vmax.f32 %v684_v25, %v656_v29 }
 0x1ba   :  { %v581_v52 = vpop.f32.mrf.mxu1 }
 0x1bb   :  { %v582_v6 = vadd.f32 %v1132_v26, %v581_v52  ;;  %v694_v27 = vmax.f32 %v657_v11, %v659_v19  ;;  %v660_v31 = vmax.f32 %v590_v14, 0.0  ;;  %v687_v52 = vmax.f32 %v685_v46, %v686_v41 }
 0x1bc   :  { %v892_v56 = vpop.f32.mrf.mxu1 }
 0x1bd   :  { %v658_v21 = vmax.f32 %v582_v6, 0.0  ;;  %v603_v32 = vadd.f32 %v892_v56, %v1132_v26  ;;  %v688_v62 = vrot.slane %v687_v52, 4 }
 0x1be   :  { %v594_v63 = vpop.f32.mrf.mxu1 }
 0x1bf   :  { %v595_v7 = vadd.f32 %v1132_v26, %v594_v63  ;;  %v695_v37 = vmax.f32 %v658_v21, %v660_v31  ;;  %v663_v42 = vmax.f32 %v603_v32, 0.0  ;;  %v689_v8 = vmax.f32 %v687_v52, %v688_v62 }
 0x1c0   :  { %v893_v5 = vpop.f32.mrf.mxu1 }
 0x1c1   :  { %v661_v28 = vmax.f32 %v595_v7, 0.0  ;;  %v606_v39 = vadd.f32 %v893_v5, %v1132_v26  ;;  %v690_v14 = vrot.slane %v689_v8, 2 }
 0x1c2   :  { %v597_v12 = vpop.f32.mrf.mxu1 }
 0x1c3   :  { %v598_v15 = vadd.f32 %v1132_v26, %v597_v12  ;;  %v696_v38 = vmax.f32 %v694_v27, %v661_v28  ;;  %v664_v48 = vmax.f32 %v606_v39, 0.0  ;;  %v691_v17 = vmax.f32 %v689_v8, %v690_v14 }
 0x1c4   :  { %v896_v20 = vpop.f32.mrf.mxu1 }
 0x1c5   :  { %v662_v33 = vmax.f32 %v598_v15, 0.0  ;;  %v619_v49 = vadd.f32 %v896_v20, %v1132_v26  ;;  %v698_v50 = vmax.f32 %v696_v38, %v663_v42  ;;  %v692_v21 = vrot.slane %v691_v17, 1 }
 0x1c6   :  { %v610_v30 = vpop.f32.mrf.mxu1 }
 0x1c7   :  { %v611_v34 = vadd.f32 %v1132_v26, %v610_v30  ;;  %v697_v43 = vmax.f32 %v695_v37, %v662_v33  ;;  %v667_v59 = vmax.f32 %v619_v49, 0.0 }
 0x1c8   :  { %v897_v36 = vpop.f32.mrf.mxu1 }
 0x1c9   :  { %v665_v44 = vmax.f32 %v611_v34, 0.0  ;;  %v622_v53 = vadd.f32 %v897_v36, %v1132_v26  ;;  %v699_v56 = vmax.f32 %v697_v43, %v664_v48 }
 0x1ca   :  { %v613_v23 = vpop.f32.mrf.mxu1 }
 0x1cb   :  { %v614_v45 = vadd.f32 %v1132_v26, %v613_v23  ;;  %v700_v55 = vmax.f32 %v698_v50, %v665_v44  ;;  %v668_v63 = vmax.f32 %v622_v53, 0.0 }
 0x1cc   :  { %v900_v47 = vpop.f32.mrf.mxu1 }
 0x1cd   :  { %v666_v51 = vmax.f32 %v614_v45, 0.0  ;;  %v635_v1 = vadd.f32 %v900_v47, %v1132_v26  ;;  %v702_v2 = vmax.f32 %v700_v55, %v667_v59 }
 0x1ce   :  { %v626_v54 = vpop.f32.mrf.mxu1 }
 0x1cf   :  { %v627_v57 = vadd.f32 %v1132_v26, %v626_v54  ;;  %v701_v60 = vmax.f32 %v699_v56, %v666_v51  ;;  %v671_v9 = vmax.f32 %v635_v1, 0.0 }
 0x1d0   :  { %v901_v58 = vpop.f32.mrf.mxu1 }
 0x1d1   :  { %v669_v61 = vmax.f32 %v627_v57, 0.0  ;;  %v638_v3 = vadd.f32 %v901_v58, %v1132_v26  ;;  %v703_v7 = vmax.f32 %v701_v60, %v668_v63 }
 0x1d2   :  { %v629_v0 = vpop.f32.mrf.mxu1 }
 0x1d3   :  { %v630_v4 = vadd.f32 %v1132_v26, %v629_v0  ;;  %v704_v5 = vmax.f32 %v702_v2, %v669_v61  ;;  %v672_v10 = vmax.f32 %v638_v3, 0.0  ;;  %v693_v26 = vmax.f32 %v691_v17, %v692_v21 }
 0x1d5   :  { %v670_v6 = vmax.f32 %v630_v4, 0.0  ;;  %v706_v12 = vmax.f32 %v704_v5, %v671_v9 }
 0x1d7   :  { %v705_v11 = vmax.f32 %v703_v7, %v670_v6 }
 0x1d9   :  { %v707_v13 = vmax.f32 %v705_v11, %v672_v10 }
 0x1db   :  { %v708_v15 = vmax.f32 %v706_v12, %v707_v13 }
 0x1dd   :  { %v709_v16 = vrot.slane %v708_v15, 4 }
 0x1df   :  { %v710_v18 = vmax.f32 %v708_v15, %v709_v16 }
 0x1e1   :  { %v711_v19 = vrot.slane %v710_v18, 2 }
 0x1e3   :  { %v712_v20 = vmax.f32 %v710_v18, %v711_v19 }
 0x1e5   :  { %v713_v28 = vrot.slane %v712_v20, 1 }
 0x1e7   :  { %v714_v22 = vmax.f32 %v712_v20, %v713_v28 }
 0x1e9   :  { %v719_v25 = vsel %vm718_vm2, %v714_v22, %v693_v26 }
 0x1ea   :  { %v721_v27 = vmax.f32 %v715_v24, %v719_v25 }
 0x1ec   :  { %722 = vst [vmem:[#allocation2] sm:$0x3] %v721_v27 }
 0x1ed   :  { %956 = shalt.err (!%p953_p4)
}
 0x1ee   :  { %732 = dma.vmem_to_hbm [thread:$0]  %s730_s17, 32, %s1175_s5, [#allocation3]  }
 0x1ef   :  { %965 = dma.done.wait [#allocation3], 32  }
 0x1f0   :  { %966 = vsyncadd [#allocation3], 4294967264 }
 0x1f1   :  { %736 = vsyncpa [#allocation3], 1 }

</bundles_post_ra>
